<compile_context>
chip_gen: v7x
topology: tpu7x:2x2x1
jax: 0.10.0
libtpu: 0.0.40
codegen_flags: <defaults>
</compile_context>

<pallas_src>
import functools

import jax
import jax.numpy as jnp
from jax import lax
from jax.experimental import pallas as pl
from jax.experimental.pallas import tpu as pltpu


# ----------------------------------------------------------------------------
# Tiling helper
# ----------------------------------------------------------------------------
def _pick_tile(dim, preferred, align):
    """Largest tile <= preferred that divides `dim` and is a multiple of
    `align`; falls back to the full dimension (always a legal single block)."""
    if dim <= preferred:
        return dim
    t = (preferred // align) * align
    while t >= align:
        if dim % t == 0:
            return t
        t -= align
    return dim


# ----------------------------------------------------------------------------
# Fused matmul + bias (+ optional ReLU) kernel
# ----------------------------------------------------------------------------
def _matmul_bias_kernel(x_ref, w_ref, b_ref, o_ref, *, activation):
    acc = jnp.dot(x_ref[...], w_ref[...], preferred_element_type=jnp.float32)
    acc = acc + b_ref[...].astype(jnp.float32)
    if activation == "relu":
        acc = jnp.maximum(acc, 0.0)
    o_ref[...] = acc.astype(o_ref.dtype)


def matmul_bias(x, w, b, *, activation=None, tm=512, tn=256):
    """out = act(x @ w + b); x:(M,K), w:(K,N), b:(N,)."""
    M, K = x.shape
    Kw, N = w.shape
    assert K == Kw and b.shape == (N,)

    TM = _pick_tile(M, tm, 8)      # rows: multiples of 8 (sublane aligned)
    TN = _pick_tile(N, tn, 128)    # output cols: lane-dense 128 blocks
    grid = (M // TM, N // TN)

    kernel = functools.partial(_matmul_bias_kernel, activation=activation)
    return pl.pallas_call(
        kernel,
        out_shape=jax.ShapeDtypeStruct((M, N), x.dtype),
        grid=grid,
        in_specs=[
            pl.BlockSpec((TM, K), lambda i, j: (i, 0)),
            pl.BlockSpec((K, TN), lambda i, j: (0, j)),
            pl.BlockSpec((1, TN), lambda i, j: (0, j)),
        ],
        out_specs=pl.BlockSpec((TM, TN), lambda i, j: (i, j)),
        compiler_params=pltpu.CompilerParams(
            dimension_semantics=("parallel", "parallel")),
    )(x, w, b.reshape(1, N))


# ----------------------------------------------------------------------------
# Fused 2x2 max-pool (stride 2) + ReLU kernel
# ----------------------------------------------------------------------------
def _pool_relu_kernel(x_ref, o_ref):
    # x_ref: (4, TR, C) -- the four pooling-window corners; o_ref: (TR, C)
    m = jnp.maximum(jnp.maximum(x_ref[0], x_ref[1]),
                    jnp.maximum(x_ref[2], x_ref[3]))
    o_ref[...] = jnp.maximum(m, 0.0).astype(o_ref.dtype)


def maxpool2x2_relu(x):
    """x: (N, H, W, C) -> relu(maxpool2x2(x)): (N, H//2, W//2, C)."""
    N, H, W, C = x.shape
    Ho, Wo = H // 2, W // 2
    # Rearrange so pooling is a reduction over a leading axis of size 4.
    xr = x.reshape(N, Ho, 2, Wo, 2, C)
    xr = xr.transpose(2, 4, 0, 1, 3, 5).reshape(4, N * Ho * Wo, C)

    M = N * Ho * Wo
    TR = _pick_tile(M, 1024, 8)
    grid = (M // TR,)

    out = pl.pallas_call(
        _pool_relu_kernel,
        out_shape=jax.ShapeDtypeStruct((M, C), x.dtype),
        grid=grid,
        in_specs=[pl.BlockSpec((4, TR, C), lambda i: (0, i, 0))],
        out_specs=pl.BlockSpec((TR, C), lambda i: (i, 0)),
        compiler_params=pltpu.CompilerParams(
            dimension_semantics=("parallel",)),
    )(xr)
    return out.reshape(N, Ho, Wo, C)


# ----------------------------------------------------------------------------
# Convolution (same padding) = im2col + Pallas GEMM
# ----------------------------------------------------------------------------
def _im2col(x, ksize, padding):
    """x: (N,H,W,Cin) -> patches (N*H*W, ksize*ksize*Cin), HWI-ordered."""
    N, H, W, C = x.shape
    xp = jnp.pad(x, ((0, 0), (padding, padding), (padding, padding), (0, 0)))
    cols = []
    for di in range(ksize):
        for dj in range(ksize):
            cols.append(xp[:, di:di + H, dj:dj + W, :])
    patches = jnp.concatenate(cols, axis=-1)       # (N, H, W, K*K*Cin)
    return patches.reshape(N * H * W, ksize * ksize * C)


def conv2d_same(x, w, b):
    """x:(N,H,W,Cin), w:(KH,KW,Cin,Cout) HWIO, b:(Cout,) -> (N,H,W,Cout)."""
    N, H, W, Cin = x.shape
    KH, KW, _, Cout = w.shape
    pad = KH // 2
    patches = _im2col(x, KH, pad)                  # (N*H*W, KH*KW*Cin)
    w2 = w.reshape(KH * KW * Cin, Cout)
    out = matmul_bias(patches, w2, b, activation=None)
    return out.reshape(N, H, W, Cout)


# ----------------------------------------------------------------------------
# Full LeNet5_TVGrad forward (eval mode -> logits)
# ----------------------------------------------------------------------------
def lenet5_forward(params, x_nchw):
    x = jnp.transpose(x_nchw, (0, 2, 3, 1))                      # NHWC
    x = conv2d_same(x, params["w1"], params["b1"])               # (N,28,28,32)
    x = maxpool2x2_relu(x)                                       # (N,14,14,32)
    x = conv2d_same(x, params["w2"], params["b2"])               # (N,14,14,64)
    x = maxpool2x2_relu(x)                                       # (N, 7, 7,64)
    # PyTorch .view(-1, 64*49) flattens NCHW channel-major.
    x = jnp.transpose(x, (0, 3, 1, 2)).reshape(x.shape[0], -1)   # (N, 3136)
    x = matmul_bias(x, params["wfc1"], params["bfc1"], activation="relu")
    logit = matmul_bias(x, params["wfc2"], params["bfc2"], activation=None)
    return logit


# Pure-JAX reference for correctness checking.
def lenet5_forward_ref(params, x_nchw):
    dn = ("NHWC", "HWIO", "NHWC")
    x = jnp.transpose(x_nchw, (0, 2, 3, 1))
    x = lax.conv_general_dilated(x, params["w1"], (1, 1), "SAME",
                                 dimension_numbers=dn) + params["b1"]
    x = jnp.maximum(lax.reduce_window(x, -jnp.inf, lax.max,
                                      (1, 2, 2, 1), (1, 2, 2, 1), "VALID"), 0.0)
    x = lax.conv_general_dilated(x, params["w2"], (1, 1), "SAME",
                                 dimension_numbers=dn) + params["b2"]
    x = jnp.maximum(lax.reduce_window(x, -jnp.inf, lax.max,
                                      (1, 2, 2, 1), (1, 2, 2, 1), "VALID"), 0.0)
    x = jnp.transpose(x, (0, 3, 1, 2)).reshape(x.shape[0], -1)
    x = jnp.maximum(x @ params["wfc1"] + params["bfc1"], 0.0)
    return x @ params["wfc2"] + params["bfc2"]


if __name__ == "__main__":
    key = jax.random.PRNGKey(0)
    keys = jax.random.split(key, 9)
    params = {
        "w1": jax.random.normal(keys[0], (5, 5, 1, 32), jnp.float32) / (5 * 5 * 1) ** 0.5,
        "b1": jax.random.normal(keys[1], (32,), jnp.float32) * 0.1,
        "w2": jax.random.normal(keys[2], (5, 5, 32, 64), jnp.float32) / (5 * 5 * 32) ** 0.5,
        "b2": jax.random.normal(keys[3], (64,), jnp.float32) * 0.1,
        "wfc1": jax.random.normal(keys[4], (64 * 49, 1024), jnp.float32) / (64 * 49) ** 0.5,
        "bfc1": jax.random.normal(keys[5], (1024,), jnp.float32) * 0.1,
        "wfc2": jax.random.normal(keys[6], (1024, 10), jnp.float32) / 1024 ** 0.5,
        "bfc2": jax.random.normal(keys[7], (10,), jnp.float32) * 0.1,
    }
    x = jax.random.normal(keys[8], (2, 1, 28, 28), jnp.float32)

    logits = jax.block_until_ready(lenet5_forward(params, x))
    ref = jax.block_until_ready(lenet5_forward_ref(params, x))

    assert logits.shape == (2, 10), logits.shape
    max_err = float(jnp.max(jnp.abs(logits - ref)))
    assert jnp.allclose(logits, ref, atol=2e-2, rtol=2e-2), f"max_err={max_err}"
    print("KERNEL_OK")
</pallas_src>

<mosaic_0001>
module attributes {stable_mosaic.version = 11 : i64} {
  func.func @_matmul_bias_kernel(%arg0: i32, %arg1: i32, %arg2: memref<392x25xf32, #tpu.memory_space<vmem>>, %arg3: memref<25x32xf32, #tpu.memory_space<vmem>>, %arg4: memref<1x32xf32, #tpu.memory_space<vmem>>, %arg5: memref<392x32xf32, #tpu.memory_space<vmem>>) attributes {dimension_semantics = [#tpu.dimension_semantics<parallel>, #tpu.dimension_semantics<parallel>], iteration_bounds = array<i64: 4, 1>, scalar_prefetch = 0 : i64, scratch_operands = 0 : i64, tpu.core_type = #tpu.core_type<tc>, window_params = [{transform_indices = @transform_0, window_bounds = array<i64: 392, 25>}, {transform_indices = @transform_1, window_bounds = array<i64: 25, 32>}, {transform_indices = @transform_2, window_bounds = array<i64: 1, 32>}, {transform_indices = @transform_3, window_bounds = array<i64: 392, 32>}]} {
    %c0 = arith.constant 0 : index
    %c0_0 = arith.constant 0 : index
    %0 = vector.load %arg2[%c0, %c0_0] : memref<392x25xf32, #tpu.memory_space<vmem>>, vector<392x25xf32>
    %c0_1 = arith.constant 0 : index
    %c0_2 = arith.constant 0 : index
    %1 = vector.load %arg3[%c0_1, %c0_2] : memref<25x32xf32, #tpu.memory_space<vmem>>, vector<25x32xf32>
    %cst = arith.constant dense<0.000000e+00> : vector<392x32xf32>
    %2 = tpu.matmul %0, %1, %cst {dimension_numbers = #tpu.dot_dimension_numbers<[1], [0], [0], [1], [0, 0, 1, 1], [], []>} : vector<392x25xf32>, vector<25x32xf32>, vector<392x32xf32> -> vector<392x32xf32>
    %c0_3 = arith.constant 0 : index
    %c0_4 = arith.constant 0 : index
    %3 = vector.load %arg4[%c0_3, %c0_4] : memref<1x32xf32, #tpu.memory_space<vmem>>, vector<1x32xf32>
    %4 = vector.broadcast %3 : vector<1x32xf32> to vector<392x32xf32>
    %5 = arith.addf %2, %4 : vector<392x32xf32>
    %c0_5 = arith.constant 0 : index
    %c0_6 = arith.constant 0 : index
    %6 = vector.load %arg5[%c0_5, %c0_6] : memref<392x32xf32, #tpu.memory_space<vmem>>, vector<392x32xf32>
    tpu.vector_store %arg5[%c0_5, %c0_6], %5 {strides = array<i32>} : memref<392x32xf32, #tpu.memory_space<vmem>>, vector<392x32xf32>,
    return
  }
  func.func @transform_0(%arg0: i32, %arg1: i32) -> (i32, i32) {
    %c0_i32 = arith.constant 0 : i32
    %c0_i32_0 = arith.constant 0 : i32
    return %arg0, %c0_i32 : i32, i32
  }
  func.func @transform_1(%arg0: i32, %arg1: i32) -> (i32, i32) {
    %c0_i32 = arith.constant 0 : i32
    %c0_i32_0 = arith.constant 0 : i32
    return %c0_i32, %arg1 : i32, i32
  }
  func.func @transform_2(%arg0: i32, %arg1: i32) -> (i32, i32) {
    %c0_i32 = arith.constant 0 : i32
    %c0_i32_0 = arith.constant 0 : i32
    return %c0_i32, %arg1 : i32, i32
  }
  func.func @transform_3(%arg0: i32, %arg1: i32) -> (i32, i32) {
    %c0_i32 = arith.constant 0 : i32
    return %arg0, %arg1 : i32, i32
  }
}

</mosaic_0001>

<bundles_post_ra>
// kernel: tpu_custom_call.1
= control target key start
LH: loop header
LB: loop body
LE: loop exit
PB: predicated region body
PF: predicated region fallthrough
CT: control target
= control target key end

     0   :  { %s1256_s12 = smov 0   ;;  %s1258_s13 = smov 0   ;;  %s1664_s0 = inlined_call_operand.vmem [shape: f32[1568,25], index: 0, kind: input, shape index: {}]   ;;  %s1665_s1 = inlined_call_operand.vmem [shape: f32[25,32], index: 1, kind: input, shape index: {}]   ;;  %s1666_s2 = inlined_call_operand.vmem [shape: f32[1,32], index: 2, kind: input, shape index: {}]   ;;  %s1667_s3 = inlined_call_operand.vmem [shape: f32[1568,32], index: 3, kind: output, shape index: {}]  }
   0x1   :  { %s1260_s14 = smov 0  }
   0x2 LB: > { %s25_s15 = sadd.s32 1, %s1226_s13  ;;  %p905_p0 = scmp.ge.s32.totalorder %s1230_s14, 1  ;;  %s1230_s14 = sphi %s1260_s14, %s13_s14   ;;  %s1226_s13 = sphi %s1258_s13, %s1669_s13   ;;  %s1222_s12 = sphi %s1256_s12, %s1668_s12  }
   0x3   : > { %p27_p1 = scmp.ge.s32.totalorder %s25_s15, 4  ;;  %p169_p2 = scmp.lt.s32.totalorder %s1230_s14, 5 }
   0x5   : > { %s1671_s15 = smov (%p27_p1, %s25_s15), 0  ;;  %p170_p3 = pnand %p905_p0, %p169_p2 }
   0x6   : > { %v274_v0 = vld [vmem:[%s1665_s1] sm:$0xff] (!%p170_p3)  ;;  %v275_v1 = vld [vmem:[%s1665_s1 + $0x8] sm:$0xff] (!%p170_p3)  ;;  %v276_v2 = vld [vmem:[%s1665_s1 + $0x10] sm:$0xff] (!%p170_p3)  ;;  %vm433_vm0 = vcmask (!%p170_p3), 1040384   ;;  %v1232_v3 = vmov (!%p170_p3), 0.0|0.0   ;;  %s203_s24 = smul.u32 (!%p170_p3), 49, %s1222_s12 }
   0x7   : > { %173 = sbr.rel (%p170_p3) target bundleno = 329 (0x149), region = 32  ;;  %1169 = vmatprep.subr.bf16.mxu0 (!%p170_p3), %v1232_v3  ;;  %v1170_v4 = vpack.c.bf16 (!%p170_p3), %v275_v1, %v274_v0  ;;  %1176 = vmatprep.subr.bf16.mxu1 (!%p170_p3), %v1232_v3  ;;  %v277_v5 = vld [vmem:[%s1665_s1 + $0x18] sm:$0x1] (!%p170_p3)  ;;  %vm1233_vm1 = vmmov (!%p170_p3), 0   ;;  %v1234_v6 = vmov (!%p170_p3), 0.0   ;;  %vm1235_vm2 = vmmov (!%p170_p3), 1  }
   0x8   : > { %1022 = vmatprep.mubr.msk.f32.mxu0 (!%p170_p3), %vm1233_vm1, %v1234_v6  ;;  %1097 = vmatprep.mubr.msk.f32.mxu1 (!%p170_p3), %vm1233_vm1, %v1234_v6  ;;  %v1173_v7 = vpack.c.bf16 (!%p170_p3), %v277_v5, %v276_v2  ;;  %p204_p4 = scmp.lt.s32.totalorder (!%p170_p3), %s203_s24, 195  ;;  %vm1174_vm3 = vmpackc.low (!%p170_p3), %vm433_vm0, %vm1235_vm2  ;;  %vm285_vm4 = vcmask (!%p170_p3), 203776   ;;  %v1499_v57 = vld [vmem:[%s1666_s2] ss:$0 sm:$0xff] (!%p170_p3)  ;;  %vm747_vm5 = vcmask (!%p170_p3), 261120  }
   0x9   : > { %1171 = vmatpush3.bf16.msra.mxu0 (!%p170_p3), %v1170_v4  ;;  %1178 = vmatpush3.bf16.msra.mxu1 (!%p170_p3), %v1170_v4 }
   0xa   : > { %1172 = vmatprep.subr.bf16.mxu0 (!%p170_p3), %v1232_v3  ;;  %1177 = vmatprep.subr.bf16.mxu1 (!%p170_p3), %v1232_v3 }
   0xd   : > { %1175 = vmatpush3.bf16.msk.msra.mxu0 (!%p170_p3), %vm1174_vm3, %v1173_v7  ;;  %1179 = vmatpush3.bf16.msk.msra.mxu1 (!%p170_p3), %vm1174_vm3, %v1173_v7 }
   0xe   : > { %s1673_s24 = smov (!%p204_p4, %s203_s24), 195 }
   0xf   : > { %s906_s25 = sshll.u32 %s1673_s24, 3 }
  0x10   : > { %s1302_s28 = scalar_lea.vmem %s1664_s0, %s906_s25  ;;  %s1506_s6 = scalar_lea.vmem %s1667_s3, %s906_s25 }
  0x11   : > { %v225_v8 = vld [vmem:[%s1302_s28] sm:$0xff]  ;;  %v250_v9 = vld [vmem:[%s1302_s28 + $0xc8] sm:$0xff]  ;;  %v251_v11 = vld [vmem:[%s1302_s28 + $0xd0] sm:$0xff] }
  0x12   : > { %1023 = vmatmul.mubr.msk.f32.vlgmr.msra.gmra.mrb[0].mxu0 %vm285_vm4, %v225_v8  ;;  %1098 = vmatmul.mubr.msk.f32.vlgmr.msra.gmra.mrb[0].mxu1 %vm285_vm4, %v250_v9  ;;  %v226_v10 = vld [vmem:[%s1302_s28 + $0x8] sm:$0xff]  ;;  %v227_v12 = vld [vmem:[%s1302_s28 + $0x10] sm:$0xff]  ;;  %v252_v13 = vld [vmem:[%s1302_s28 + $0xd8] sm:$0xff] }
  0x13   : > { %1025 = vmatprep.mubr.msk.f32.mxu0 %vm1233_vm1, %v1234_v6  ;;  %1100 = vmatprep.mubr.msk.f32.mxu1 %vm1233_vm1, %v1234_v6  ;;  %v228_v14 = vld [vmem:[%s1302_s28 + $0x18] sm:$0xff]  ;;  %v253_v15 = vld [vmem:[%s1302_s28 + $0xe0] sm:$0xff]  ;;  %v254_v17 = vld [vmem:[%s1302_s28 + $0xe8] sm:$0xff] }
  0x14   : > { %v229_v16 = vld [vmem:[%s1302_s28 + $0x20] sm:$0xff]  ;;  %v230_v18 = vld [vmem:[%s1302_s28 + $0x28] sm:$0xff]  ;;  %v255_v19 = vld [vmem:[%s1302_s28 + $0xf0] sm:$0xff] }
  0x15   : > { %v231_v20 = vld [vmem:[%s1302_s28 + $0x30] sm:$0xff]  ;;  %v256_v21 = vld [vmem:[%s1302_s28 + $0xf8] sm:$0xff]  ;;  %v257_v23 = vld [vmem:[%s1302_s28 + $0x100] sm:$0xff] }
  0x16   : > { %1026 = vmatmul.mubr.msk.f32.gmra.mrb[2].mxu0 %vm285_vm4, %v226_v10  ;;  %1101 = vmatmul.mubr.msk.f32.gmra.mrb[2].mxu1 %vm285_vm4, %v251_v11  ;;  %v232_v22 = vld [vmem:[%s1302_s28 + $0x38] sm:$0xff]  ;;  %v233_v24 = vld [vmem:[%s1302_s28 + $0x40] sm:$0xff]  ;;  %v258_v25 = vld [vmem:[%s1302_s28 + $0x108] sm:$0xff] }
  0x17   : > { %1028 = vmatprep.mubr.msk.f32.mxu0 %vm1233_vm1, %v1234_v6  ;;  %1103 = vmatprep.mubr.msk.f32.mxu1 %vm1233_vm1, %v1234_v6  ;;  %v234_v26 = vld [vmem:[%s1302_s28 + $0x48] sm:$0xff]  ;;  %v259_v27 = vld [vmem:[%s1302_s28 + $0x110] sm:$0xff]  ;;  %v260_v29 = vld [vmem:[%s1302_s28 + $0x118] sm:$0xff] }
  0x18   : > { %v235_v28 = vld [vmem:[%s1302_s28 + $0x50] sm:$0xff]  ;;  %v236_v30 = vld [vmem:[%s1302_s28 + $0x58] sm:$0xff]  ;;  %v261_v31 = vld [vmem:[%s1302_s28 + $0x120] sm:$0xff] }
  0x19   : > { %v237_v32 = vld [vmem:[%s1302_s28 + $0x60] sm:$0xff]  ;;  %v262_v33 = vld [vmem:[%s1302_s28 + $0x128] sm:$0xff]  ;;  %v263_v35 = vld [vmem:[%s1302_s28 + $0x130] sm:$0xff] }
  0x1a   : > { %1029 = vmatmul.mubr.msk.f32.gmra.mrb[4].mxu0 %vm285_vm4, %v227_v12  ;;  %1104 = vmatmul.mubr.msk.f32.gmra.mrb[4].mxu1 %vm285_vm4, %v252_v13  ;;  %v238_v34 = vld [vmem:[%s1302_s28 + $0x68] sm:$0xff]  ;;  %v239_v36 = vld [vmem:[%s1302_s28 + $0x70] sm:$0xff]  ;;  %v264_v37 = vld [vmem:[%s1302_s28 + $0x138] sm:$0xff] }
  0x1b   : > { %1031 = vmatprep.mubr.msk.f32.mxu0 %vm1233_vm1, %v1234_v6  ;;  %1106 = vmatprep.mubr.msk.f32.mxu1 %vm1233_vm1, %v1234_v6  ;;  %v240_v38 = vld [vmem:[%s1302_s28 + $0x78] sm:$0xff]  ;;  %v265_v39 = vld [vmem:[%s1302_s28 + $0x140] sm:$0xff]  ;;  %v266_v41 = vld [vmem:[%s1302_s28 + $0x148] sm:$0xff] }
  0x1c   : > { %v241_v40 = vld [vmem:[%s1302_s28 + $0x80] sm:$0xff]  ;;  %v242_v42 = vld [vmem:[%s1302_s28 + $0x88] sm:$0xff]  ;;  %v267_v43 = vld [vmem:[%s1302_s28 + $0x150] sm:$0xff] }
  0x1d   : > { %v243_v44 = vld [vmem:[%s1302_s28 + $0x90] sm:$0xff]  ;;  %v268_v45 = vld [vmem:[%s1302_s28 + $0x158] sm:$0xff]  ;;  %v269_v47 = vld [vmem:[%s1302_s28 + $0x160] sm:$0xff] }
  0x1e   : > { %1032 = vmatmul.mubr.msk.f32.gmra.mrb[6].mxu0 %vm285_vm4, %v228_v14  ;;  %1107 = vmatmul.mubr.msk.f32.gmra.mrb[6].mxu1 %vm285_vm4, %v253_v15  ;;  %v244_v46 = vld [vmem:[%s1302_s28 + $0x98] sm:$0xff]  ;;  %v245_v48 = vld [vmem:[%s1302_s28 + $0xa0] sm:$0xff]  ;;  %v270_v49 = vld [vmem:[%s1302_s28 + $0x168] sm:$0xff] }
  0x1f   : > { %1034 = vmatprep.mubr.msk.f32.mxu0 %vm1233_vm1, %v1234_v6  ;;  %1109 = vmatprep.mubr.msk.f32.mxu1 %vm1233_vm1, %v1234_v6  ;;  %v246_v50 = vld [vmem:[%s1302_s28 + $0xa8] sm:$0xff]  ;;  %v271_v51 = vld [vmem:[%s1302_s28 + $0x170] sm:$0xff]  ;;  %v272_v53 = vld [vmem:[%s1302_s28 + $0x178] sm:$0xff] }
  0x20   : > { %v247_v52 = vld [vmem:[%s1302_s28 + $0xb0] sm:$0xff]  ;;  %v248_v54 = vld [vmem:[%s1302_s28 + $0xb8] sm:$0xff]  ;;  %v273_v55 = vld [vmem:[%s1302_s28 + $0x180] sm:$0xff] }
  0x21   : > { %v249_v56 = vld [vmem:[%s1302_s28 + $0xc0] sm:$0xff] }
  0x22   : > { %1035 = vmatmul.mubr.msk.f32.gmra.mrb[8].mxu0 %vm285_vm4, %v229_v16  ;;  %1110 = vmatmul.mubr.msk.f32.gmra.mrb[8].mxu1 %vm285_vm4, %v254_v17 }
  0x23   : > { %1037 = vmatprep.mubr.msk.f32.mxu0 %vm1233_vm1, %v1234_v6  ;;  %1112 = vmatprep.mubr.msk.f32.mxu1 %vm1233_vm1, %v1234_v6 }
  0x26   : > { %1038 = vmatmul.mubr.msk.f32.gmra.mrb[10].mxu0 %vm285_vm4, %v230_v18  ;;  %1113 = vmatmul.mubr.msk.f32.gmra.mrb[10].mxu1 %vm285_vm4, %v255_v19 }
  0x27   : > { %1040 = vmatprep.mubr.msk.f32.mxu0 %vm1233_vm1, %v1234_v6  ;;  %1115 = vmatprep.mubr.msk.f32.mxu1 %vm1233_vm1, %v1234_v6 }
  0x2a   : > { %1041 = vmatmul.mubr.msk.f32.gmra.mrb[12].mxu0 %vm285_vm4, %v231_v20  ;;  %1116 = vmatmul.mubr.msk.f32.gmra.mrb[12].mxu1 %vm285_vm4, %v256_v21 }
  0x2b   : > { %1043 = vmatprep.mubr.msk.f32.mxu0 %vm1233_vm1, %v1234_v6  ;;  %1118 = vmatprep.mubr.msk.f32.mxu1 %vm1233_vm1, %v1234_v6 }
  0x2e   : > { %1044 = vmatmul.mubr.msk.f32.gmra.mrb[14].mxu0 %vm285_vm4, %v232_v22  ;;  %1119 = vmatmul.mubr.msk.f32.gmra.mrb[14].mxu1 %vm285_vm4, %v257_v23 }
  0x2f   : > { %1046 = vmatprep.mubr.msk.f32.mxu0 %vm1233_vm1, %v1234_v6  ;;  %1121 = vmatprep.mubr.msk.f32.mxu1 %vm1233_vm1, %v1234_v6 }
  0x32   : > { %1047 = vmatmul.mubr.msk.f32.gmra.mrb[16].mxu0 %vm285_vm4, %v233_v24  ;;  %1122 = vmatmul.mubr.msk.f32.gmra.mrb[16].mxu1 %vm285_vm4, %v258_v25 }
  0x33   : > { %1049 = vmatprep.mubr.msk.f32.mxu0 %vm1233_vm1, %v1234_v6  ;;  %1124 = vmatprep.mubr.msk.f32.mxu1 %vm1233_vm1, %v1234_v6 }
  0x36   : > { %1050 = vmatmul.mubr.msk.f32.gmra.mrb[18].mxu0 %vm285_vm4, %v234_v26  ;;  %1125 = vmatmul.mubr.msk.f32.gmra.mrb[18].mxu1 %vm285_vm4, %v259_v27 }
  0x37   : > { %1052 = vmatprep.mubr.msk.f32.mxu0 %vm1233_vm1, %v1234_v6  ;;  %1127 = vmatprep.mubr.msk.f32.mxu1 %vm1233_vm1, %v1234_v6 }
  0x3a   : > { %1053 = vmatmul.mubr.msk.f32.gmra.mrb[20].mxu0 %vm285_vm4, %v235_v28  ;;  %1128 = vmatmul.mubr.msk.f32.gmra.mrb[20].mxu1 %vm285_vm4, %v260_v29 }
  0x3b   : > { %1055 = vmatprep.mubr.msk.f32.mxu0 %vm1233_vm1, %v1234_v6  ;;  %1130 = vmatprep.mubr.msk.f32.mxu1 %vm1233_vm1, %v1234_v6 }
  0x3e   : > { %1056 = vmatmul.mubr.msk.f32.gmra.mrb[22].mxu0 %vm285_vm4, %v236_v30  ;;  %1131 = vmatmul.mubr.msk.f32.gmra.mrb[22].mxu1 %vm285_vm4, %v261_v31 }
  0x3f   : > { %1058 = vmatprep.mubr.msk.f32.mxu0 %vm1233_vm1, %v1234_v6  ;;  %1133 = vmatprep.mubr.msk.f32.mxu1 %vm1233_vm1, %v1234_v6 }
  0x42   : > { %1059 = vmatmul.mubr.msk.f32.gmra.mrb[24].mxu0 %vm285_vm4, %v237_v32  ;;  %1134 = vmatmul.mubr.msk.f32.gmra.mrb[24].mxu1 %vm285_vm4, %v262_v33 }
  0x43   : > { %1061 = vmatprep.mubr.msk.f32.mxu0 %vm1233_vm1, %v1234_v6  ;;  %1136 = vmatprep.mubr.msk.f32.mxu1 %vm1233_vm1, %v1234_v6 }
  0x46   : > { %1062 = vmatmul.mubr.msk.f32.gmra.mrb[26].mxu0 %vm285_vm4, %v238_v34  ;;  %1137 = vmatmul.mubr.msk.f32.gmra.mrb[26].mxu1 %vm285_vm4, %v263_v35 }
  0x47   : > { %1064 = vmatprep.mubr.msk.f32.mxu0 %vm1233_vm1, %v1234_v6  ;;  %1139 = vmatprep.mubr.msk.f32.mxu1 %vm1233_vm1, %v1234_v6 }
  0x4a   : > { %1065 = vmatmul.mubr.msk.f32.gmra.mrb[28].mxu0 %vm285_vm4, %v239_v36  ;;  %1140 = vmatmul.mubr.msk.f32.gmra.mrb[28].mxu1 %vm285_vm4, %v264_v37 }
  0x4b   : > { %1067 = vmatprep.mubr.msk.f32.mxu0 %vm1233_vm1, %v1234_v6  ;;  %1142 = vmatprep.mubr.msk.f32.mxu1 %vm1233_vm1, %v1234_v6 }
  0x4e   : > { %1068 = vmatmul.mubr.msk.f32.gmra.mrb[30].mxu0 %vm285_vm4, %v240_v38  ;;  %1143 = vmatmul.mubr.msk.f32.gmra.mrb[30].mxu1 %vm285_vm4, %v265_v39 }
  0x4f   : > { %1070 = vmatprep.mubr.msk.f32.mxu0 %vm1233_vm1, %v1234_v6  ;;  %1145 = vmatprep.mubr.msk.f32.mxu1 %vm1233_vm1, %v1234_v6 }
  0x52   : > { %1071 = vmatmul.mubr.msk.f32.gmra.mrb[32].mxu0 %vm285_vm4, %v241_v40  ;;  %1146 = vmatmul.mubr.msk.f32.gmra.mrb[32].mxu1 %vm285_vm4, %v266_v41 }
  0x53   : > { %1073 = vmatprep.mubr.msk.f32.mxu0 %vm1233_vm1, %v1234_v6  ;;  %1148 = vmatprep.mubr.msk.f32.mxu1 %vm1233_vm1, %v1234_v6 }
  0x56   : > { %1074 = vmatmul.mubr.msk.f32.gmra.mrb[34].mxu0 %vm285_vm4, %v242_v42  ;;  %1149 = vmatmul.mubr.msk.f32.gmra.mrb[34].mxu1 %vm285_vm4, %v267_v43 }
  0x57   : > { %1076 = vmatprep.mubr.msk.f32.mxu0 %vm1233_vm1, %v1234_v6  ;;  %1151 = vmatprep.mubr.msk.f32.mxu1 %vm1233_vm1, %v1234_v6 }
  0x5a   : > { %1077 = vmatmul.mubr.msk.f32.gmra.mrb[36].mxu0 %vm285_vm4, %v243_v44  ;;  %1152 = vmatmul.mubr.msk.f32.gmra.mrb[36].mxu1 %vm285_vm4, %v268_v45 }
  0x5b   : > { %1079 = vmatprep.mubr.msk.f32.mxu0 %vm1233_vm1, %v1234_v6  ;;  %1154 = vmatprep.mubr.msk.f32.mxu1 %vm1233_vm1, %v1234_v6 }
  0x5e   : > { %1080 = vmatmul.mubr.msk.f32.gmra.mrb[38].mxu0 %vm285_vm4, %v244_v46  ;;  %1155 = vmatmul.mubr.msk.f32.gmra.mrb[38].mxu1 %vm285_vm4, %v269_v47 }
  0x5f   : > { %1082 = vmatprep.mubr.msk.f32.mxu0 %vm1233_vm1, %v1234_v6  ;;  %1157 = vmatprep.mubr.msk.f32.mxu1 %vm1233_vm1, %v1234_v6 }
  0x62   : > { %1083 = vmatmul.mubr.msk.f32.gmra.mrb[40].mxu0 %vm285_vm4, %v245_v48  ;;  %1158 = vmatmul.mubr.msk.f32.gmra.mrb[40].mxu1 %vm285_vm4, %v270_v49 }
  0x63   : > { %1085 = vmatprep.mubr.msk.f32.mxu0 %vm1233_vm1, %v1234_v6  ;;  %1160 = vmatprep.mubr.msk.f32.mxu1 %vm1233_vm1, %v1234_v6 }
  0x66   : > { %1086 = vmatmul.mubr.msk.f32.gmra.mrb[42].mxu0 %vm285_vm4, %v246_v50  ;;  %1161 = vmatmul.mubr.msk.f32.gmra.mrb[42].mxu1 %vm285_vm4, %v271_v51 }
  0x67   : > { %1088 = vmatprep.mubr.msk.f32.mxu0 %vm1233_vm1, %v1234_v6  ;;  %1163 = vmatprep.mubr.msk.f32.mxu1 %vm1233_vm1, %v1234_v6 }
  0x6a   : > { %1089 = vmatmul.mubr.msk.f32.gmra.mrb[44].mxu0 %vm285_vm4, %v247_v52  ;;  %1164 = vmatmul.mubr.msk.f32.gmra.mrb[44].mxu1 %vm285_vm4, %v272_v53 }
  0x6b   : > { %1091 = vmatprep.mubr.msk.f32.mxu0 %vm1233_vm1, %v1234_v6  ;;  %1166 = vmatprep.mubr.msk.f32.mxu1 %vm1233_vm1, %v1234_v6 }
  0x6e   : > { %1092 = vmatmul.mubr.msk.f32.gmra.mrb[46].mxu0 %vm285_vm4, %v248_v54  ;;  %1167 = vmatmul.mubr.msk.f32.gmra.mrb[46].mxu1 %vm285_vm4, %v273_v55 }
  0x6f   : > { %1094 = vmatprep.mubr.msk.f32.mxu0 %vm1233_vm1, %v1234_v6 }
  0x72   : > { %1095 = vmatmul.mubr.msk.f32.gmra.mrb[48].mxu0 %vm285_vm4, %v249_v56 }
  0xe5   : > { %v503_v58 = vpop.f32.mrb[0].mxu0  ;;  %v628_v59 = vpop.f32.mrb[0].mxu1 }
  0xe6   : > { %v504_v60 = vadd.f32 %v1499_v57, %v503_v58  ;;  %v1024_v61 = vpop.f32.mrb[1].mxu0  ;;  %v629_v62 = vadd.f32 %v1499_v57, %v628_v59  ;;  %v1099_v63 = vpop.f32.mrb[1].mxu1 }
  0xe8   : > { %748 = vst.msk [vmem:[%s1506_s6] sm:$0xff] %vm747_vm5, %v504_v60  ;;  %773 = vst.msk [vmem:[%s1506_s6 + $0xc8] sm:$0xff] %vm747_vm5, %v629_v62 }
  0xe9   : > { %v508_v0 = vpop.f32.mrb[2].mxu0  ;;  %v633_v1 = vpop.f32.mrb[2].mxu1 }
  0xea   : > { %v509_v2 = vadd.f32 %v1499_v57, %v508_v0  ;;  %v1027_v3 = vpop.f32.mrb[3].mxu0  ;;  %v634_v4 = vadd.f32 %v1499_v57, %v633_v1  ;;  %v1102_v5 = vpop.f32.mrb[3].mxu1 }
  0xec   : > { %749 = vst.msk [vmem:[%s1506_s6 + $0x8] sm:$0xff] %vm747_vm5, %v509_v2  ;;  %774 = vst.msk [vmem:[%s1506_s6 + $0xd0] sm:$0xff] %vm747_vm5, %v634_v4 }
  0xed   : > { %v513_v6 = vpop.f32.mrb[4].mxu0  ;;  %v638_v7 = vpop.f32.mrb[4].mxu1 }
  0xee   : > { %v514_v8 = vadd.f32 %v1499_v57, %v513_v6  ;;  %v1030_v9 = vpop.f32.mrb[5].mxu0  ;;  %v639_v10 = vadd.f32 %v1499_v57, %v638_v7  ;;  %v1105_v11 = vpop.f32.mrb[5].mxu1 }
  0xf0   : > { %750 = vst.msk [vmem:[%s1506_s6 + $0x10] sm:$0xff] %vm747_vm5, %v514_v8  ;;  %775 = vst.msk [vmem:[%s1506_s6 + $0xd8] sm:$0xff] %vm747_vm5, %v639_v10 }
  0xf1   : > { %v518_v12 = vpop.f32.mrb[6].mxu0  ;;  %v643_v13 = vpop.f32.mrb[6].mxu1 }
  0xf2   : > { %v519_v14 = vadd.f32 %v1499_v57, %v518_v12  ;;  %v1033_v15 = vpop.f32.mrb[7].mxu0  ;;  %v644_v16 = vadd.f32 %v1499_v57, %v643_v13  ;;  %v1108_v17 = vpop.f32.mrb[7].mxu1 }
  0xf4   : > { %751 = vst.msk [vmem:[%s1506_s6 + $0x18] sm:$0xff] %vm747_vm5, %v519_v14  ;;  %776 = vst.msk [vmem:[%s1506_s6 + $0xe0] sm:$0xff] %vm747_vm5, %v644_v16 }
  0xf5   : > { %v523_v18 = vpop.f32.mrb[8].mxu0  ;;  %v648_v19 = vpop.f32.mrb[8].mxu1 }
  0xf6   : > { %v524_v20 = vadd.f32 %v1499_v57, %v523_v18  ;;  %v1036_v21 = vpop.f32.mrb[9].mxu0  ;;  %v649_v22 = vadd.f32 %v1499_v57, %v648_v19  ;;  %v1111_v23 = vpop.f32.mrb[9].mxu1 }
  0xf8   : > { %752 = vst.msk [vmem:[%s1506_s6 + $0x20] sm:$0xff] %vm747_vm5, %v524_v20  ;;  %777 = vst.msk [vmem:[%s1506_s6 + $0xe8] sm:$0xff] %vm747_vm5, %v649_v22 }
  0xf9   : > { %v528_v24 = vpop.f32.mrb[10].mxu0  ;;  %v653_v25 = vpop.f32.mrb[10].mxu1 }
  0xfa   : > { %v529_v26 = vadd.f32 %v1499_v57, %v528_v24  ;;  %v1039_v27 = vpop.f32.mrb[11].mxu0  ;;  %v654_v28 = vadd.f32 %v1499_v57, %v653_v25  ;;  %v1114_v29 = vpop.f32.mrb[11].mxu1 }
  0xfc   : > { %753 = vst.msk [vmem:[%s1506_s6 + $0x28] sm:$0xff] %vm747_vm5, %v529_v26  ;;  %778 = vst.msk [vmem:[%s1506_s6 + $0xf0] sm:$0xff] %vm747_vm5, %v654_v28 }
  0xfd   : > { %v533_v30 = vpop.f32.mrb[12].mxu0  ;;  %v658_v31 = vpop.f32.mrb[12].mxu1 }
  0xfe   : > { %v534_v32 = vadd.f32 %v1499_v57, %v533_v30  ;;  %v1042_v33 = vpop.f32.mrb[13].mxu0  ;;  %v659_v34 = vadd.f32 %v1499_v57, %v658_v31  ;;  %v1117_v35 = vpop.f32.mrb[13].mxu1 }
 0x100   : > { %754 = vst.msk [vmem:[%s1506_s6 + $0x30] sm:$0xff] %vm747_vm5, %v534_v32  ;;  %779 = vst.msk [vmem:[%s1506_s6 + $0xf8] sm:$0xff] %vm747_vm5, %v659_v34 }
 0x101   : > { %v538_v36 = vpop.f32.mrb[14].mxu0  ;;  %v663_v37 = vpop.f32.mrb[14].mxu1 }
 0x102   : > { %v539_v38 = vadd.f32 %v1499_v57, %v538_v36  ;;  %v1045_v39 = vpop.f32.mrb[15].mxu0  ;;  %v664_v40 = vadd.f32 %v1499_v57, %v663_v37  ;;  %v1120_v41 = vpop.f32.mrb[15].mxu1 }
 0x104   : > { %755 = vst.msk [vmem:[%s1506_s6 + $0x38] sm:$0xff] %vm747_vm5, %v539_v38  ;;  %780 = vst.msk [vmem:[%s1506_s6 + $0x100] sm:$0xff] %vm747_vm5, %v664_v40 }
 0x105   : > { %v543_v42 = vpop.f32.mrb[16].mxu0  ;;  %v668_v43 = vpop.f32.mrb[16].mxu1 }
 0x106   : > { %v544_v44 = vadd.f32 %v1499_v57, %v543_v42  ;;  %v1048_v45 = vpop.f32.mrb[17].mxu0  ;;  %v669_v46 = vadd.f32 %v1499_v57, %v668_v43  ;;  %v1123_v47 = vpop.f32.mrb[17].mxu1 }
 0x108   : > { %756 = vst.msk [vmem:[%s1506_s6 + $0x40] sm:$0xff] %vm747_vm5, %v544_v44  ;;  %781 = vst.msk [vmem:[%s1506_s6 + $0x108] sm:$0xff] %vm747_vm5, %v669_v46 }
 0x109   : > { %v548_v48 = vpop.f32.mrb[18].mxu0  ;;  %v673_v49 = vpop.f32.mrb[18].mxu1 }
 0x10a   : > { %v549_v50 = vadd.f32 %v1499_v57, %v548_v48  ;;  %v1051_v51 = vpop.f32.mrb[19].mxu0  ;;  %v674_v52 = vadd.f32 %v1499_v57, %v673_v49  ;;  %v1126_v53 = vpop.f32.mrb[19].mxu1 }
 0x10c   : > { %757 = vst.msk [vmem:[%s1506_s6 + $0x48] sm:$0xff] %vm747_vm5, %v549_v50  ;;  %782 = vst.msk [vmem:[%s1506_s6 + $0x110] sm:$0xff] %vm747_vm5, %v674_v52 }
 0x10d   : > { %v553_v54 = vpop.f32.mrb[20].mxu0  ;;  %v678_v55 = vpop.f32.mrb[20].mxu1 }
 0x10e   : > { %v554_v56 = vadd.f32 %v1499_v57, %v553_v54  ;;  %v1054_v58 = vpop.f32.mrb[21].mxu0  ;;  %v679_v59 = vadd.f32 %v1499_v57, %v678_v55  ;;  %v1129_v60 = vpop.f32.mrb[21].mxu1 }
 0x110   : > { %758 = vst.msk [vmem:[%s1506_s6 + $0x50] sm:$0xff] %vm747_vm5, %v554_v56  ;;  %783 = vst.msk [vmem:[%s1506_s6 + $0x118] sm:$0xff] %vm747_vm5, %v679_v59 }
 0x111   : > { %v558_v61 = vpop.f32.mrb[22].mxu0  ;;  %v683_v62 = vpop.f32.mrb[22].mxu1 }
 0x112   : > { %v559_v63 = vadd.f32 %v1499_v57, %v558_v61  ;;  %v1057_v0 = vpop.f32.mrb[23].mxu0  ;;  %v684_v1 = vadd.f32 %v1499_v57, %v683_v62  ;;  %v1132_v2 = vpop.f32.mrb[23].mxu1 }
 0x114   : > { %759 = vst.msk [vmem:[%s1506_s6 + $0x58] sm:$0xff] %vm747_vm5, %v559_v63  ;;  %784 = vst.msk [vmem:[%s1506_s6 + $0x120] sm:$0xff] %vm747_vm5, %v684_v1 }
 0x115   : > { %v563_v3 = vpop.f32.mrb[24].mxu0  ;;  %v688_v4 = vpop.f32.mrb[24].mxu1 }
 0x116   : > { %v564_v5 = vadd.f32 %v1499_v57, %v563_v3  ;;  %v1060_v6 = vpop.f32.mrb[25].mxu0  ;;  %v689_v7 = vadd.f32 %v1499_v57, %v688_v4  ;;  %v1135_v8 = vpop.f32.mrb[25].mxu1 }
 0x118   : > { %760 = vst.msk [vmem:[%s1506_s6 + $0x60] sm:$0xff] %vm747_vm5, %v564_v5  ;;  %785 = vst.msk [vmem:[%s1506_s6 + $0x128] sm:$0xff] %vm747_vm5, %v689_v7 }
 0x119   : > { %v568_v9 = vpop.f32.mrb[26].mxu0  ;;  %v693_v10 = vpop.f32.mrb[26].mxu1 }
 0x11a   : > { %v569_v11 = vadd.f32 %v1499_v57, %v568_v9  ;;  %v1063_v12 = vpop.f32.mrb[27].mxu0  ;;  %v694_v13 = vadd.f32 %v1499_v57, %v693_v10  ;;  %v1138_v14 = vpop.f32.mrb[27].mxu1 }
 0x11c   : > { %761 = vst.msk [vmem:[%s1506_s6 + $0x68] sm:$0xff] %vm747_vm5, %v569_v11  ;;  %786 = vst.msk [vmem:[%s1506_s6 + $0x130] sm:$0xff] %vm747_vm5, %v694_v13 }
 0x11d   : > { %v573_v15 = vpop.f32.mrb[28].mxu0  ;;  %v698_v16 = vpop.f32.mrb[28].mxu1 }
 0x11e   : > { %v574_v17 = vadd.f32 %v1499_v57, %v573_v15  ;;  %v1066_v18 = vpop.f32.mrb[29].mxu0  ;;  %v699_v19 = vadd.f32 %v1499_v57, %v698_v16  ;;  %v1141_v20 = vpop.f32.mrb[29].mxu1 }
 0x120   : > { %762 = vst.msk [vmem:[%s1506_s6 + $0x70] sm:$0xff] %vm747_vm5, %v574_v17  ;;  %787 = vst.msk [vmem:[%s1506_s6 + $0x138] sm:$0xff] %vm747_vm5, %v699_v19 }
 0x121   : > { %v578_v21 = vpop.f32.mrb[30].mxu0  ;;  %v703_v22 = vpop.f32.mrb[30].mxu1 }
 0x122   : > { %v579_v23 = vadd.f32 %v1499_v57, %v578_v21  ;;  %v1069_v24 = vpop.f32.mrb[31].mxu0  ;;  %v704_v25 = vadd.f32 %v1499_v57, %v703_v22  ;;  %v1144_v26 = vpop.f32.mrb[31].mxu1 }
 0x124   : > { %763 = vst.msk [vmem:[%s1506_s6 + $0x78] sm:$0xff] %vm747_vm5, %v579_v23  ;;  %788 = vst.msk [vmem:[%s1506_s6 + $0x140] sm:$0xff] %vm747_vm5, %v704_v25 }
 0x125   : > { %v583_v27 = vpop.f32.mrb[32].mxu0  ;;  %v708_v28 = vpop.f32.mrb[32].mxu1 }
 0x126   : > { %v584_v29 = vadd.f32 %v1499_v57, %v583_v27  ;;  %v1072_v30 = vpop.f32.mrb[33].mxu0  ;;  %v709_v31 = vadd.f32 %v1499_v57, %v708_v28  ;;  %v1147_v32 = vpop.f32.mrb[33].mxu1 }
 0x128   : > { %764 = vst.msk [vmem:[%s1506_s6 + $0x80] sm:$0xff] %vm747_vm5, %v584_v29  ;;  %789 = vst.msk [vmem:[%s1506_s6 + $0x148] sm:$0xff] %vm747_vm5, %v709_v31 }
 0x129   : > { %v588_v33 = vpop.f32.mrb[34].mxu0  ;;  %v713_v34 = vpop.f32.mrb[34].mxu1 }
 0x12a   : > { %v589_v35 = vadd.f32 %v1499_v57, %v588_v33  ;;  %v1075_v36 = vpop.f32.mrb[35].mxu0  ;;  %v714_v37 = vadd.f32 %v1499_v57, %v713_v34  ;;  %v1150_v38 = vpop.f32.mrb[35].mxu1 }
 0x12c   : > { %765 = vst.msk [vmem:[%s1506_s6 + $0x88] sm:$0xff] %vm747_vm5, %v589_v35  ;;  %790 = vst.msk [vmem:[%s1506_s6 + $0x150] sm:$0xff] %vm747_vm5, %v714_v37 }
 0x12d   : > { %v593_v39 = vpop.f32.mrb[36].mxu0  ;;  %v718_v40 = vpop.f32.mrb[36].mxu1 }
 0x12e   : > { %v594_v41 = vadd.f32 %v1499_v57, %v593_v39  ;;  %v1078_v42 = vpop.f32.mrb[37].mxu0  ;;  %v719_v43 = vadd.f32 %v1499_v57, %v718_v40  ;;  %v1153_v44 = vpop.f32.mrb[37].mxu1 }
 0x130   : > { %766 = vst.msk [vmem:[%s1506_s6 + $0x90] sm:$0xff] %vm747_vm5, %v594_v41  ;;  %791 = vst.msk [vmem:[%s1506_s6 + $0x158] sm:$0xff] %vm747_vm5, %v719_v43 }
 0x131   : > { %v598_v45 = vpop.f32.mrb[38].mxu0  ;;  %v723_v46 = vpop.f32.mrb[38].mxu1 }
 0x132   : > { %v599_v47 = vadd.f32 %v1499_v57, %v598_v45  ;;  %v1081_v48 = vpop.f32.mrb[39].mxu0  ;;  %v724_v49 = vadd.f32 %v1499_v57, %v723_v46  ;;  %v1156_v50 = vpop.f32.mrb[39].mxu1 }
 0x134   : > { %767 = vst.msk [vmem:[%s1506_s6 + $0x98] sm:$0xff] %vm747_vm5, %v599_v47  ;;  %792 = vst.msk [vmem:[%s1506_s6 + $0x160] sm:$0xff] %vm747_vm5, %v724_v49 }
 0x135   : > { %v603_v51 = vpop.f32.mrb[40].mxu0  ;;  %v728_v52 = vpop.f32.mrb[40].mxu1 }
 0x136   : > { %v604_v53 = vadd.f32 %v1499_v57, %v603_v51  ;;  %v1084_v54 = vpop.f32.mrb[41].mxu0  ;;  %v729_v55 = vadd.f32 %v1499_v57, %v728_v52  ;;  %v1159_v56 = vpop.f32.mrb[41].mxu1 }
 0x138   : > { %768 = vst.msk [vmem:[%s1506_s6 + $0xa0] sm:$0xff] %vm747_vm5, %v604_v53  ;;  %793 = vst.msk [vmem:[%s1506_s6 + $0x168] sm:$0xff] %vm747_vm5, %v729_v55 }
 0x139   : > { %v608_v58 = vpop.f32.mrb[42].mxu0  ;;  %v733_v59 = vpop.f32.mrb[42].mxu1 }
 0x13a   : > { %v609_v60 = vadd.f32 %v1499_v57, %v608_v58  ;;  %v1087_v61 = vpop.f32.mrb[43].mxu0  ;;  %v734_v62 = vadd.f32 %v1499_v57, %v733_v59  ;;  %v1162_v63 = vpop.f32.mrb[43].mxu1 }
 0x13c   : > { %769 = vst.msk [vmem:[%s1506_s6 + $0xa8] sm:$0xff] %vm747_vm5, %v609_v60  ;;  %794 = vst.msk [vmem:[%s1506_s6 + $0x170] sm:$0xff] %vm747_vm5, %v734_v62 }
 0x13d   : > { %v613_v0 = vpop.f32.mrb[44].mxu0  ;;  %v738_v1 = vpop.f32.mrb[44].mxu1 }
 0x13e   : > { %v614_v2 = vadd.f32 %v1499_v57, %v613_v0  ;;  %v1090_v3 = vpop.f32.mrb[45].mxu0  ;;  %v739_v4 = vadd.f32 %v1499_v57, %v738_v1  ;;  %v1165_v5 = vpop.f32.mrb[45].mxu1 }
 0x140   : > { %770 = vst.msk [vmem:[%s1506_s6 + $0xb0] sm:$0xff] %vm747_vm5, %v614_v2  ;;  %795 = vst.msk [vmem:[%s1506_s6 + $0x178] sm:$0xff] %vm747_vm5, %v739_v4 }
 0x141   : > { %v618_v6 = vpop.f32.mrb[46].mxu0  ;;  %v743_v7 = vpop.f32.mrb[46].mxu1 }
 0x142   : > { %v619_v8 = vadd.f32 %v1499_v57, %v618_v6  ;;  %v1093_v9 = vpop.f32.mrb[47].mxu0  ;;  %v744_v10 = vadd.f32 %v1499_v57, %v743_v7  ;;  %v1168_v11 = vpop.f32.mrb[47].mxu1 }
 0x144   : > { %771 = vst.msk [vmem:[%s1506_s6 + $0xb8] sm:$0xff] %vm747_vm5, %v619_v8  ;;  %796 = vst.msk [vmem:[%s1506_s6 + $0x180] sm:$0xff] %vm747_vm5, %v744_v10 }
 0x145   : > { %v623_v12 = vpop.f32.mrb[48].mxu0 }
 0x146   : > { %v624_v13 = vadd.f32 %v1499_v57, %v623_v12  ;;  %v1096_v14 = vpop.f32.mrb[49].mxu0 }
 0x148   : > { %772 = vst.msk [vmem:[%s1506_s6 + $0xc0] sm:$0xff] %vm747_vm5, %v624_v13 }
 0x149 PF: > { %s13_s14 = sadd.s32 1, %s1230_s14   ;;  %s1668_s12 = smov %s1226_s13 }
 0x14a   : > { %p10_p5 = scmp.ge.s32.totalorder %s13_s14, 6   ;;  %s1669_s13 = smov %s1671_s15 }
 0x14c   :  { %12 = sbr.rel (!%p10_p5) target bundleno = 2 (0x2), region = 68 }

</bundles_post_ra>
